<compile_context>
chip_gen: v6e
topology: v6e:2x2x1
jax: 0.10.0
libtpu: 0.0.40
codegen_flags: <defaults>
</compile_context>

<pallas_src>
import jax
import jax.numpy as jnp
from jax.experimental import pallas as pl
from jax.experimental.pallas import tpu as pltpu


# ---------------------------------------------------------------------------
# Fused kernel: both EmbedBranches + LinearWeightedAvg + logits head
# ---------------------------------------------------------------------------
def _fop_kernel(faces_ref, voices_ref, wf_ref, bf_ref, wv_ref, bv_ref,
                w12_ref, wl_ref, bl_ref,
                feats_ref, logits_ref, faces_emb_ref, voices_emb_ref):
    # ---- face branch: Linear(+folded BN) -> ReLU -> L2 normalize ----
    zf = jnp.dot(faces_ref[...], wf_ref[...],
                 preferred_element_type=jnp.float32) + bf_ref[...]
    zf = jnp.maximum(zf, 0.0)
    nf = jnp.maximum(jnp.sqrt(jnp.sum(zf * zf, axis=-1, keepdims=True)), 1e-12)
    f_emb = zf * pl.reciprocal(nf, approx=True)
    faces_emb_ref[...] = f_emb.astype(faces_emb_ref.dtype)

    # ---- voice branch ----
    zv = jnp.dot(voices_ref[...], wv_ref[...],
                 preferred_element_type=jnp.float32) + bv_ref[...]
    zv = jnp.maximum(zv, 0.0)
    nv = jnp.maximum(jnp.sqrt(jnp.sum(zv * zv, axis=-1, keepdims=True)), 1e-12)
    v_emb = zv * pl.reciprocal(nv, approx=True)
    voices_emb_ref[...] = v_emb.astype(voices_emb_ref.dtype)

    # ---- LinearWeightedAvg (scalars in SMEM, math in f32) ----
    feats = w12_ref[0] * f_emb + w12_ref[1] * v_emb
    feats_ref[...] = feats.astype(feats_ref.dtype)

    # ---- logits head ----
    logits = jnp.dot(feats, wl_ref[...],
                     preferred_element_type=jnp.float32) + bl_ref[...]
    logits_ref[...] = logits.astype(logits_ref.dtype)


# ---------------------------------------------------------------------------
# Wrapper
# ---------------------------------------------------------------------------
def _round_up(x, m):
    return ((x + m - 1) // m) * m


def _choose_tile_b(B, tile_b):
    """Sublane-aligned batch tile; keep the grid >= 2 steps where possible."""
    if B <= 8:
        return B
    tb = min(tile_b, _round_up(-(-B // 2), 8))   # at most ~half the batch
    tb = _round_up(tb, 8)
    return min(tb, B)


def _fold_bn(p, eps):
    """Fold eval-mode BatchNorm1d + Linear bias into (W', b')."""
    inv_std = 1.0 / jnp.sqrt(p["running_var"].astype(jnp.float32) + eps)
    scale = p["gamma"].astype(jnp.float32) * inv_std
    shift = (p["beta"].astype(jnp.float32)
             - p["running_mean"].astype(jnp.float32) * scale)
    w = p["w"].astype(jnp.float32) * scale[None, :]
    b = (p["b"].astype(jnp.float32) * scale + shift).reshape(1, -1)
    return w, b


def fop_forward(params, faces, voices, *, tile_b=1024, bn_eps=1e-5):
    """Pallas equivalent of FOP.forward: returns ([feats, logits], faces, voices)."""
    B, Ff = faces.shape
    Bv, Fv = voices.shape
    assert B == Bv, "faces/voices batch mismatch"
    E = params["face_branch"]["w"].shape[1]
    C = params["logits_w"].shape[1]

    tb = _choose_tile_b(B, tile_b)

    wf, bf = _fold_bn(params["face_branch"], bn_eps)
    wv, bv = _fold_bn(params["voice_branch"], bn_eps)
    w12 = jnp.concatenate(
        [params["fusion_w1"].reshape(-1), params["fusion_w2"].reshape(-1)]
    ).astype(jnp.float32)
    wl = params["logits_w"].astype(jnp.float32)
    bl = params["logits_b"].astype(jnp.float32).reshape(1, C)

    feats, logits, faces_emb, voices_emb = pl.pallas_call(
        _fop_kernel,
        out_shape=(
            jax.ShapeDtypeStruct((B, E), faces.dtype),    # feats
            jax.ShapeDtypeStruct((B, C), faces.dtype),    # logits
            jax.ShapeDtypeStruct((B, E), faces.dtype),    # faces_emb
            jax.ShapeDtypeStruct((B, E), voices.dtype),   # voices_emb
        ),
        grid=(pl.cdiv(B, tb),),
        in_specs=[
            pl.BlockSpec((tb, Ff), lambda i: (i, 0)),     # faces tile
            pl.BlockSpec((tb, Fv), lambda i: (i, 0)),     # voices tile
            pl.BlockSpec((Ff, E), lambda i: (0, 0)),      # face weight (BN folded, resident)
            pl.BlockSpec((1, E), lambda i: (0, 0)),       # face bias'
            pl.BlockSpec((Fv, E), lambda i: (0, 0)),      # voice weight (BN folded, resident)
            pl.BlockSpec((1, E), lambda i: (0, 0)),       # voice bias'
            pl.BlockSpec(memory_space=pltpu.SMEM),        # (w1, w2) scalars
            pl.BlockSpec((E, C), lambda i: (0, 0)),       # logits weight (resident)
            pl.BlockSpec((1, C), lambda i: (0, 0)),       # logits bias
        ],
        out_specs=(
            pl.BlockSpec((tb, E), lambda i: (i, 0)),
            pl.BlockSpec((tb, C), lambda i: (i, 0)),
            pl.BlockSpec((tb, E), lambda i: (i, 0)),
            pl.BlockSpec((tb, E), lambda i: (i, 0)),
        ),
        compiler_params=pltpu.CompilerParams(
            dimension_semantics=("parallel",)),
    )(faces, voices, wf, bf, wv, bv, w12, wl, bl)

    return [feats, logits], faces_emb, voices_emb


# ---------------------------------------------------------------------------
# Demo / correctness check
# ---------------------------------------------------------------------------
if __name__ == "__main__":
    key = jax.random.PRNGKey(0)
    ks = jax.random.split(key, 8)

    batch = 16
    face_feat_dim = 64
    voice_feat_dim = 96
    dim_embed = 128      # lane-dense embedding width (multiple of 128)
    n_class = 10

    def init_branch(k, f_in, f_out):
        k1, k2, k3, k4, k5, k6 = jax.random.split(k, 6)
        return dict(
            w=jax.random.normal(k1, (f_in, f_out), jnp.float32) * 0.1,
            b=jax.random.normal(k2, (f_out,), jnp.float32) * 0.1,
            gamma=jax.random.uniform(k3, (f_out,), jnp.float32, 0.5, 1.5),
            beta=jax.random.normal(k4, (f_out,), jnp.float32) * 0.1,
            running_mean=jax.random.normal(k5, (f_out,), jnp.float32) * 0.1,
            running_var=jax.random.uniform(k6, (f_out,), jnp.float32, 0.5, 1.5),
        )

    params = dict(
        voice_branch=init_branch(ks[0], voice_feat_dim, dim_embed),
        face_branch=init_branch(ks[1], face_feat_dim, dim_embed),
        fusion_w1=jax.random.uniform(ks[2], (1,), jnp.float32),   # torch.rand(1)
        fusion_w2=jax.random.uniform(ks[3], (1,), jnp.float32),   # torch.rand(1)
        logits_w=jax.random.normal(ks[4], (dim_embed, n_class), jnp.float32) * 0.1,
        logits_b=jax.random.normal(ks[5], (n_class,), jnp.float32) * 0.1,
    )

    faces = jax.random.normal(ks[6], (batch, face_feat_dim), jnp.float32)
    voices = jax.random.normal(ks[7], (batch, voice_feat_dim), jnp.float32)

    # Default tile_b=1024 -> chooser picks 8 rows here, so the demo still
    # exercises a multi-step, double-buffered grid (grid=(2,)).
    (feats, logits), faces_emb, voices_emb = fop_forward(params, faces, voices)
    jax.block_until_ready((feats, logits, faces_emb, voices_emb))

    # Plain-JAX reference (eval-mode module math).
    def ref_branch(x, p, eps=1e-5):
        z = x @ p["w"] + p["b"]
        z = (z - p["running_mean"]) / jnp.sqrt(p["running_var"] + eps) * p["gamma"] + p["beta"]
        z = jnp.maximum(z, 0.0)
        n = jnp.sqrt(jnp.sum(z * z, axis=1, keepdims=True))
        return z / jnp.maximum(n, 1e-12)

    v_ref = ref_branch(voices, params["voice_branch"])
    f_ref = ref_branch(faces, params["face_branch"])
    feats_ref = params["fusion_w1"][0] * f_ref + params["fusion_w2"][0] * v_ref
    logits_ref = feats_ref @ params["logits_w"] + params["logits_b"]

    assert jnp.allclose(voices_emb, v_ref, atol=2e-3, rtol=2e-3), "voice branch mismatch"
    assert jnp.allclose(faces_emb, f_ref, atol=2e-3, rtol=2e-3), "face branch mismatch"
    assert jnp.allclose(feats, feats_ref, atol=2e-3, rtol=2e-3), "fusion mismatch"
    assert jnp.allclose(logits, logits_ref, atol=2e-3, rtol=2e-3), "logits mismatch"

    print("KERNEL_OK")
</pallas_src>

<mosaic_0001>
module attributes {stable_mosaic.version = 11 : i64} {
  func.func @_fop_kernel(%arg0: i32, %arg1: memref<8x64xf32, #tpu.memory_space<vmem>>, %arg2: memref<8x96xf32, #tpu.memory_space<vmem>>, %arg3: memref<64x128xf32, #tpu.memory_space<vmem>>, %arg4: memref<1x128xf32, #tpu.memory_space<vmem>>, %arg5: memref<96x128xf32, #tpu.memory_space<vmem>>, %arg6: memref<1x128xf32, #tpu.memory_space<vmem>>, %arg7: memref<2xf32, #tpu.memory_space<smem>>, %arg8: memref<128x10xf32, #tpu.memory_space<vmem>>, %arg9: memref<1x10xf32, #tpu.memory_space<vmem>>, %arg10: memref<8x128xf32, #tpu.memory_space<vmem>>, %arg11: memref<8x10xf32, #tpu.memory_space<vmem>>, %arg12: memref<8x128xf32, #tpu.memory_space<vmem>>, %arg13: memref<8x128xf32, #tpu.memory_space<vmem>>) attributes {dimension_semantics = [#tpu.dimension_semantics<parallel>], iteration_bounds = array<i64: 2>, scalar_prefetch = 0 : i64, scratch_operands = 0 : i64, tpu.core_type = #tpu.core_type<tc>, window_params = [{transform_indices = @transform_0, window_bounds = array<i64: 8, 64>}, {transform_indices = @transform_1, window_bounds = array<i64: 8, 96>}, {pipeline_mode = #tpu.pipeline_mode<synchronous>, transform_indices = @transform_2, window_bounds = array<i64: 64, 128>}, {pipeline_mode = #tpu.pipeline_mode<synchronous>, transform_indices = @transform_3, window_bounds = array<i64: 1, 128>}, {pipeline_mode = #tpu.pipeline_mode<synchronous>, transform_indices = @transform_4, window_bounds = array<i64: 96, 128>}, {pipeline_mode = #tpu.pipeline_mode<synchronous>, transform_indices = @transform_5, window_bounds = array<i64: 1, 128>}, {transform_indices = @transform_6, window_bounds = array<i64: 2>}, {pipeline_mode = #tpu.pipeline_mode<synchronous>, transform_indices = @transform_7, window_bounds = array<i64: 128, 10>}, {pipeline_mode = #tpu.pipeline_mode<synchronous>, transform_indices = @transform_8, window_bounds = array<i64: 1, 10>}, {transform_indices = @transform_9, window_bounds = array<i64: 8, 128>}, {transform_indices = @transform_10, window_bounds = array<i64: 8, 10>}, {transform_indices = @transform_11, window_bounds = array<i64: 8, 128>}, {transform_indices = @transform_12, window_bounds = array<i64: 8, 128>}]} {
    %c0 = arith.constant 0 : index
    %c0_0 = arith.constant 0 : index
    %0 = vector.load %arg1[%c0, %c0_0] : memref<8x64xf32, #tpu.memory_space<vmem>>, vector<8x64xf32>
    %c0_1 = arith.constant 0 : index
    %c0_2 = arith.constant 0 : index
    %1 = vector.load %arg3[%c0_1, %c0_2] : memref<64x128xf32, #tpu.memory_space<vmem>>, vector<64x128xf32>
    %cst = arith.constant dense<0.000000e+00> : vector<8x128xf32>
    %2 = tpu.matmul %0, %1, %cst {dimension_numbers = #tpu.dot_dimension_numbers<[1], [0], [0], [1], [0, 0, 1, 1], [], []>} : vector<8x64xf32>, vector<64x128xf32>, vector<8x128xf32> -> vector<8x128xf32>
    %c0_3 = arith.constant 0 : index
    %c0_4 = arith.constant 0 : index
    %3 = vector.load %arg4[%c0_3, %c0_4] : memref<1x128xf32, #tpu.memory_space<vmem>>, vector<1x128xf32>
    %4 = vector.broadcast %3 : vector<1x128xf32> to vector<8x128xf32>
    %5 = arith.addf %2, %4 : vector<8x128xf32>
    %cst_5 = arith.constant 0.000000e+00 : f32
    %6 = vector.broadcast %cst_5 : f32 to vector<8x128xf32>
    %7 = arith.maximumf %5, %6 : vector<8x128xf32>
    %8 = arith.mulf %7, %7 : vector<8x128xf32>
    %cst_6 = arith.constant dense<0.000000e+00> : vector<8xf32>
    %9 = vector.multi_reduction <add>, %8, %cst_6 [1] : vector<8x128xf32> to vector<8xf32>
    %10 = vector.shape_cast %9 : vector<8xf32> to vector<8x1xf32>
    %11 = math.sqrt %10 : vector<8x1xf32>
    %cst_7 = arith.constant 9.99999996E-13 : f32
    %12 = vector.broadcast %cst_7 : f32 to vector<8x1xf32>
    %13 = arith.maximumf %11, %12 : vector<8x1xf32>
    %14 = tpu.reciprocal %13 {approx = true} : vector<8x1xf32> -> vector<8x1xf32>
    %15 = vector.broadcast %14 : vector<8x1xf32> to vector<8x128xf32>
    %16 = arith.mulf %7, %15 : vector<8x128xf32>
    %c0_8 = arith.constant 0 : index
    %c0_9 = arith.constant 0 : index
    %17 = vector.load %arg12[%c0_8, %c0_9] : memref<8x128xf32, #tpu.memory_space<vmem>>, vector<8x128xf32>
    tpu.vector_store %arg12[%c0_8, %c0_9], %16 {strides = array<i32>} : memref<8x128xf32, #tpu.memory_space<vmem>>, vector<8x128xf32>,
    %c0_10 = arith.constant 0 : index
    %c0_11 = arith.constant 0 : index
    %18 = vector.load %arg2[%c0_10, %c0_11] : memref<8x96xf32, #tpu.memory_space<vmem>>, vector<8x96xf32>
    %c0_12 = arith.constant 0 : index
    %c0_13 = arith.constant 0 : index
    %19 = vector.load %arg5[%c0_12, %c0_13] : memref<96x128xf32, #tpu.memory_space<vmem>>, vector<96x128xf32>
    %cst_14 = arith.constant dense<0.000000e+00> : vector<8x128xf32>
    %20 = tpu.matmul %18, %19, %cst_14 {dimension_numbers = #tpu.dot_dimension_numbers<[1], [0], [0], [1], [0, 0, 1, 1], [], []>} : vector<8x96xf32>, vector<96x128xf32>, vector<8x128xf32> -> vector<8x128xf32>
    %c0_15 = arith.constant 0 : index
    %c0_16 = arith.constant 0 : index
    %21 = vector.load %arg6[%c0_15, %c0_16] : memref<1x128xf32, #tpu.memory_space<vmem>>, vector<1x128xf32>
    %22 = vector.broadcast %21 : vector<1x128xf32> to vector<8x128xf32>
    %23 = arith.addf %20, %22 : vector<8x128xf32>
    %cst_17 = arith.constant 0.000000e+00 : f32
    %24 = vector.broadcast %cst_17 : f32 to vector<8x128xf32>
    %25 = arith.maximumf %23, %24 : vector<8x128xf32>
    %26 = arith.mulf %25, %25 : vector<8x128xf32>
    %cst_18 = arith.constant dense<0.000000e+00> : vector<8xf32>
    %27 = vector.multi_reduction <add>, %26, %cst_18 [1] : vector<8x128xf32> to vector<8xf32>
    %28 = vector.shape_cast %27 : vector<8xf32> to vector<8x1xf32>
    %29 = math.sqrt %28 : vector<8x1xf32>
    %cst_19 = arith.constant 9.99999996E-13 : f32
    %30 = vector.broadcast %cst_19 : f32 to vector<8x1xf32>
    %31 = arith.maximumf %29, %30 : vector<8x1xf32>
    %32 = tpu.reciprocal %31 {approx = true} : vector<8x1xf32> -> vector<8x1xf32>
    %33 = vector.broadcast %32 : vector<8x1xf32> to vector<8x128xf32>
    %34 = arith.mulf %25, %33 : vector<8x128xf32>
    %c0_20 = arith.constant 0 : index
    %c0_21 = arith.constant 0 : index
    %35 = vector.load %arg13[%c0_20, %c0_21] : memref<8x128xf32, #tpu.memory_space<vmem>>, vector<8x128xf32>
    tpu.vector_store %arg13[%c0_20, %c0_21], %34 {strides = array<i32>} : memref<8x128xf32, #tpu.memory_space<vmem>>, vector<8x128xf32>,
    %c0_22 = arith.constant 0 : index
    %36 = memref.load %arg7[%c0_22] : memref<2xf32, #tpu.memory_space<smem>>
    %37 = vector.broadcast %36 : f32 to vector<8x128xf32>
    %38 = arith.mulf %37, %16 : vector<8x128xf32>
    %c1 = arith.constant 1 : index
    %39 = memref.load %arg7[%c1] : memref<2xf32, #tpu.memory_space<smem>>
    %40 = vector.broadcast %39 : f32 to vector<8x128xf32>
    %41 = arith.mulf %40, %34 : vector<8x128xf32>
    %42 = arith.addf %38, %41 : vector<8x128xf32>
    %c0_23 = arith.constant 0 : index
    %c0_24 = arith.constant 0 : index
    %43 = vector.load %arg10[%c0_23, %c0_24] : memref<8x128xf32, #tpu.memory_space<vmem>>, vector<8x128xf32>
    tpu.vector_store %arg10[%c0_23, %c0_24], %42 {strides = array<i32>} : memref<8x128xf32, #tpu.memory_space<vmem>>, vector<8x128xf32>,
    %c0_25 = arith.constant 0 : index
    %c0_26 = arith.constant 0 : index
    %44 = vector.load %arg8[%c0_25, %c0_26] : memref<128x10xf32, #tpu.memory_space<vmem>>, vector<128x10xf32>
    %cst_27 = arith.constant dense<0.000000e+00> : vector<8x10xf32>
    %45 = tpu.matmul %42, %44, %cst_27 {dimension_numbers = #tpu.dot_dimension_numbers<[1], [0], [0], [1], [0, 0, 1, 1], [], []>} : vector<8x128xf32>, vector<128x10xf32>, vector<8x10xf32> -> vector<8x10xf32>
    %c0_28 = arith.constant 0 : index
    %c0_29 = arith.constant 0 : index
    %46 = vector.load %arg9[%c0_28, %c0_29] : memref<1x10xf32, #tpu.memory_space<vmem>>, vector<1x10xf32>
    %47 = vector.broadcast %46 : vector<1x10xf32> to vector<8x10xf32>
    %48 = arith.addf %45, %47 : vector<8x10xf32>
    %c0_30 = arith.constant 0 : index
    %c0_31 = arith.constant 0 : index
    %49 = vector.load %arg11[%c0_30, %c0_31] : memref<8x10xf32, #tpu.memory_space<vmem>>, vector<8x10xf32>
    tpu.vector_store %arg11[%c0_30, %c0_31], %48 {strides = array<i32>} : memref<8x10xf32, #tpu.memory_space<vmem>>, vector<8x10xf32>,
    return
  }
  func.func @transform_0(%arg0: i32) -> (i32, i32) {
    %c0_i32 = arith.constant 0 : i32
    %c0_i32_0 = arith.constant 0 : i32
    return %arg0, %c0_i32 : i32, i32
  }
  func.func @transform_1(%arg0: i32) -> (i32, i32) {
    %c0_i32 = arith.constant 0 : i32
    %c0_i32_0 = arith.constant 0 : i32
    return %arg0, %c0_i32 : i32, i32
  }
  func.func @transform_2(%arg0: i32) -> (i32, i32) {
    %c0_i32 = arith.constant 0 : i32
    %c0_i32_0 = arith.constant 0 : i32
    %c0_i32_1 = arith.constant 0 : i32
    return %c0_i32, %c0_i32_0 : i32, i32
  }
  func.func @transform_3(%arg0: i32) -> (i32, i32) {
    %c0_i32 = arith.constant 0 : i32
    %c0_i32_0 = arith.constant 0 : i32
    %c0_i32_1 = arith.constant 0 : i32
    return %c0_i32, %c0_i32_0 : i32, i32
  }
  func.func @transform_4(%arg0: i32) -> (i32, i32) {
    %c0_i32 = arith.constant 0 : i32
    %c0_i32_0 = arith.constant 0 : i32
    %c0_i32_1 = arith.constant 0 : i32
    return %c0_i32, %c0_i32_0 : i32, i32
  }
  func.func @transform_5(%arg0: i32) -> (i32, i32) {
    %c0_i32 = arith.constant 0 : i32
    %c0_i32_0 = arith.constant 0 : i32
    %c0_i32_1 = arith.constant 0 : i32
    return %c0_i32, %c0_i32_0 : i32, i32
  }
  func.func @transform_6(%arg0: i32) -> i32 {
    %c0_i32 = arith.constant 0 : i32
    %c0_i32_0 = arith.constant 0 : i32
    return %c0_i32 : i32
  }
  func.func @transform_7(%arg0: i32) -> (i32, i32) {
    %c0_i32 = arith.constant 0 : i32
    %c0_i32_0 = arith.constant 0 : i32
    %c0_i32_1 = arith.constant 0 : i32
    return %c0_i32, %c0_i32_0 : i32, i32
  }
  func.func @transform_8(%arg0: i32) -> (i32, i32) {
    %c0_i32 = arith.constant 0 : i32
    %c0_i32_0 = arith.constant 0 : i32
    %c0_i32_1 = arith.constant 0 : i32
    return %c0_i32, %c0_i32_0 : i32, i32
  }
  func.func @transform_9(%arg0: i32) -> (i32, i32) {
    %c0_i32 = arith.constant 0 : i32
    %c0_i32_0 = arith.constant 0 : i32
    return %arg0, %c0_i32 : i32, i32
  }
  func.func @transform_10(%arg0: i32) -> (i32, i32) {
    %c0_i32 = arith.constant 0 : i32
    %c0_i32_0 = arith.constant 0 : i32
    return %arg0, %c0_i32 : i32, i32
  }
  func.func @transform_11(%arg0: i32) -> (i32, i32) {
    %c0_i32 = arith.constant 0 : i32
    %c0_i32_0 = arith.constant 0 : i32
    return %arg0, %c0_i32 : i32, i32
  }
  func.func @transform_12(%arg0: i32) -> (i32, i32) {
    %c0_i32 = arith.constant 0 : i32
    %c0_i32_0 = arith.constant 0 : i32
    return %arg0, %c0_i32 : i32, i32
  }
}

</mosaic_0001>

<bundles_post_ra>
// kernel: tpu_custom_call.1
= control target key start
LH: loop header
LB: loop body
LE: loop exit
PB: predicated region body
PF: predicated region fallthrough
CT: control target
= control target key end

     0   :  { %s1951_s0 = inlined_call_operand.vmem [shape: f32[16,64], index: 0, kind: input, shape index: {}]   ;;  %s1952_s1 = inlined_call_operand.vmem [shape: f32[16,96], index: 1, kind: input, shape index: {}]   ;;  %s1953_s2 = inlined_call_operand.hbm [shape: f32[64,128], index: 2, kind: input, shape index: {}]   ;;  %s1954_s3 = inlined_call_operand.vmem [shape: f32[1,128], index: 3, kind: input, shape index: {}]   ;;  %s1955_s4 = inlined_call_operand.vmem [shape: f32[96,128], index: 4, kind: input, shape index: {}]   ;;  %s1956_s5 = inlined_call_operand.vmem [shape: f32[1,128], index: 5, kind: input, shape index: {}]   ;;  %s1957_s6 = inlined_call_operand.vmem [shape: f32[2], index: 6, kind: input, shape index: {}]   ;;  %s1958_s7 = inlined_call_operand.vmem [shape: f32[128,10], index: 7, kind: input, shape index: {}]   ;;  %s1959_s8 = inlined_call_operand.vmem [shape: f32[1,10], index: 8, kind: input, shape index: {}]   ;;  %s1960_s9 = inlined_call_operand.hbm [shape: f32[16,128], index: 9, kind: output, shape index: {0}]   ;;  %s1961_s10 = inlined_call_operand.hbm [shape: f32[16,10], index: 10, kind: output, shape index: {1}]   ;;  %s1962_s11 = inlined_call_operand.hbm [shape: f32[16,128], index: 11, kind: output, shape index: {2}]   ;;  %s1963_s12 = inlined_call_operand.hbm [shape: f32[16,128], index: 12, kind: output, shape index: {3}]  }
   0x1   :  { %1968 = sst [smem:[#allocation18_spill]] %s1951_s0 }
   0x2   :  { %1969 = sst [smem:[#allocation19_spill]] %s1952_s1 }
   0x3   :  { %1970 = sst [smem:[#allocation20_spill]] %s1953_s2 }
   0x4   :  { %1971 = sst [smem:[#allocation21_spill]] %s1954_s3 }
   0x5   :  { %1972 = sst [smem:[#allocation22_spill]] %s1955_s4 }
   0x6   :  { %1973 = sst [smem:[#allocation23_spill]] %s1956_s5 }
   0x7   :  { %1974 = sst [smem:[#allocation24_spill]] %s1957_s6 }
   0x8   :  { %18 = vsyncpa [#allocation3], 0 }
   0x9   :  { %19 = vsyncpa [#allocation5], 0 }
   0xa   :  { %20 = vsyncpa [#allocation4], 0 }
   0xb   :  { %22 = vsyncpa [#allocation4 + $0x1], 0 }
   0xc   :  { %23 = vsyncpa [#allocation9], 0 }
   0xd   :  { %25 = vsyncpa [#allocation9 + $0x1], 0 }
   0xe   :  { %26 = vsyncpa [#allocation12], 0 }
   0xf   :  { %28 = vsyncpa [#allocation12 + $0x1], 0  ;;  %s1565_s21 = smov 0   ;;  %s1567_s22 = smov 0  }
  0x10   :  { %s1569_s23 = smov 0   ;;  %s1571_s24 = smov 0  }
  0x11 LB: > { %s1586_s25 = sadd.s32 4294967295, %s1488_s24   ;;  %s1964_s26 = sadd.s32 4294967294, %s1488_s24   ;;  %s1488_s24 = sphi %s1571_s24, %s1997_s24   ;;  %s1484_s23 = sphi %s1569_s23, %s1996_s23   ;;  %s1480_s22 = sphi %s1567_s22, %s1995_s22   ;;  %s1476_s21 = sphi %s1565_s21, %s1994_s21  }
  0x12   : > { %s1590_s27 = sadd.s32 1, %s1488_s24   ;;  %s240_s28 = sadd.s32 1, %s1484_s23 }
  0x13   : > { %s237_s29 = ssub.s32 %s1488_s24, %s1590_s27  ;;  %p250_p0 = scmp.ne.s32.totalorder %s1484_s23, %s1480_s22 }
  0x14   : > { %p238_p1 = scmp.eq.s32.totalorder %s237_s29, 0  ;;  %p251_p2 = scmp.eq.s32.totalorder %s1586_s25, 1 }
  0x15   : > { %p256_p3 = scmp.ne.s32.totalorder %s1480_s22, %s1476_s21  ;;  %p257_p4 = scmp.eq.s32.totalorder %s1964_s26, 1 }
  0x16   : > { %s1603_s30 = scalar_select %p238_p1, %s1484_s23, %s240_s28  }
  0x17   : > { %p1605_p5 = por %p251_p2, %p250_p0  ;;  %p1609_p6 = por %p257_p4, %p256_p3 }
  0x18   : > { %p1057_p7 = scmp.ge.s32.totalorder %s1488_s24, 1  ;;  %p342_p8 = scmp.lt.s32.totalorder %s1488_s24, 3 }
  0x19   : > { %s1976_s14 = scalar_select %p1609_p6, 1, 0 }
  0x1a   : > { %p1965_p9 = scmp.eq.s32.totalorder %s1586_s25, 0  ;;  %p1616_p10 = pnand %p1057_p7, %p342_p8 }
  0x1b   : > { %s1490_s16 = smov [#allocation2]   ;;  %s1978_s6 = sld [smem:[#allocation24_spill]] }
  0x1c   : > { %s354_s17 = sshll.u32 %s1490_s16, 4  ;;  %p1222_p11 = pneg %p1616_p10  ;;  %s355_s17 = int_to_ptr.vmem [resolvable:$true] %s354_s17 }
  0x1d   : > { %s1304_s29 = scalar_lea.vmem %s355_s17, 1024  ;;  %p1312_p3 = scmp.lt.s32.totalorder %s355_s17, %s355_s17 }
  0x1e   : > { %p1627_p12 = pnand %p1965_p9, %p1222_p11  ;;  %p1305_p0 = scmp.ne.s32.totalorder %s355_s17, %s1304_s29 }
  0x1f   : > { %p1313_p4 = scmp.lt.s32.totalorder %s1304_s29, %s1304_s29 }
  0x20   : > { %p1295_p13 = pneg %p1627_p12 }
  0x21   : > { %s377_s20 = sshll.u32 %s1978_s6, 4  ;;  %p1314_p7 = por %p1313_p4, %p1312_p3  ;;  %s378_s20 = int_to_ptr.vmem [resolvable:$true] %s377_s20 }
  0x22   : > { %p1307_p1 = pnand %p1305_p0, %p1295_p13 }
  0x24   : > { %p1308_p2 = pneg %p1307_p1 }
  0x26   : > { %p1315_p8 = pnand %p1314_p7, %p1308_p2 }
  0x28   : > { %1318 = shalt.err (!%p1315_p8)
}
  0x29   : > { %s1491_s16 = smov 128   ;;  %s1492_s18 = smov 8  }
  0x2a   : > { %s1980_s2 = sld [smem:[#allocation20_spill]]  ;;  %s1319_s6 = scalar_lea.vmem %s378_s20, 16 }
  0x2b   : > { %p1320_p11 = scmp.ne.s32.totalorder %s378_s20, %s1319_s6  ;;  %p1327_p9 = scmp.lt.s32.totalorder %s378_s20, %s378_s20 }
  0x2c   : > { %p1328_p6 = scmp.lt.s32.totalorder %s1319_s6, %s1319_s6 }
  0x2d   : > { %p1322_p0 = pnand %p1320_p11, %p1295_p13 }
  0x2e   : > { %p1329_p3 = por %p1328_p6, %p1327_p9 }
  0x2f   : > { %p1323_p1 = pneg %p1322_p0 }
  0x30   : > { %1225 = dma.hbm_to_vmem [thread:$0]  (!%p1627_p12), %s1980_s2, 1024, %s355_s17, [#allocation3], %s1491_s16, %s1491_s16, %s1492_s18  }
  0x31   : > { %p1330_p2 = pnand %p1329_p3, %p1323_p1 }
  0x33   : > { %1333 = shalt.err (!%p1330_p2)
}
  0x34   : > { %s1493_s29 = smov [#allocation6]   ;;  %410 = sbr.rel (%p1616_p10) target bundleno = 711 (0x2c7), region = 56 }
  0x35   : > { %1228 = dma.vmem_to_smem (!%p1627_p12), %s378_s20, 16, %s1493_s29, [#allocation5]  }
  0x36   : > { %p1981_p4 = scmp.eq.s32.totalorder (!%p1616_p10), %s1586_s25, 0 }
  0x39   : > { %1455 = dma.done.wait (%p1981_p4), [#allocation3], 1024   ;;  %p1982_p7 = pmov %p1981_p4 }
  0x3a   : > { %p1983_p13 = pmov %p1981_p4 }
  0x3b   : > { %1457 = vsyncadd (%p1982_p7), [#allocation3], 4294966272 }
  0x3c   : > { %1459 = dma.done.wait (%p1983_p13), [#allocation5], 16   ;;  %p1984_p6 = pmov %p1981_p4 }
  0x3e   : > { %1461 = vsyncadd (%p1984_p6), [#allocation5], 4294967280 }
  0x3f   : > { %420 = sfence }
  0x40   : > { %v491_v0 = vld [vmem:[#allocation2 + $0x38] sm:$0xff]  ;;  %p475_p9 = scmp.lt.s32.totalorder %s1586_s25, 1  ;;  %v1494_v1 = vmov 0.0   ;;  %v490_v2 = vld [vmem:[#allocation2 + $0x30] sm:$0xff]  ;;  %vm1495_vm0 = vmmov 0   ;;  %v489_v3 = vld [vmem:[#allocation2 + $0x28] sm:$0xff] }
  0x41   : > { %1125 = vmatprep.subr.mxu1 %v1494_v1  ;;  %1141 = vmatprep.mubr.msk.f32.mxu1 %vm1495_vm0, %v1494_v1  ;;  %v488_v4 = vld [vmem:[#allocation2 + $0x20] sm:$0xff]  ;;  %v487_v5 = vld [vmem:[#allocation2 + $0x18] sm:$0xff]  ;;  %v486_v6 = vld [vmem:[#allocation2 + $0x10] sm:$0xff]  ;;  %s1985_s0 = sld [smem:[#allocation18_spill]]  ;;  %vm499_vm1 = vcmask 523264   ;;  %vm608_vm2 = vcmask 785408  }
  0x42   : > { %1126 = vmatpush3.msra.mxu1 %v491_v0  ;;  %1171 = vmatprep.subr.mxu0 %v1494_v1  ;;  %s1665_s6 = scalar_select %p475_p9, %s1586_s25, 1  ;;  %v485_v7 = vld [vmem:[#allocation2 + $0x8] sm:$0xff]  ;;  %v484_v8 = vld [vmem:[#allocation2] sm:$0xff]  ;;  %v720_v35 = vld [vmem:[%s1958_s7 + $0x78] sm:$0xff] }
  0x43   : > { %1127 = vmatprep.subr.mxu1 %v1494_v1  ;;  %1203 = vmatprep.mubr.msk.f32.mxu0 %vm1495_vm0, %v1494_v1  ;;  %s1986_s4 = sld [smem:[#allocation22_spill]]  ;;  %v719_v36 = vld [vmem:[%s1958_s7 + $0x70] sm:$0xff]  ;;  %v718_v37 = vld [vmem:[%s1958_s7 + $0x68] sm:$0xff]  ;;  %v717_v38 = vld [vmem:[%s1958_s7 + $0x60] sm:$0xff]  ;;  %s1812_s18 = sand.u32 1, %s1480_s22  }
  0x44   : > { %1128 = vmatpush3.msra.mxu1 %v490_v2  ;;  %s1068_s26 = sshll.u32 %s1665_s6, 3  ;;  %s1987_s1 = sld [smem:[#allocation19_spill]]  ;;  %1172 = vmatpush3.msra.mxu0 %v720_v35  ;;  %v716_v39 = vld [vmem:[%s1958_s7 + $0x58] sm:$0xff]  ;;  %v715_v40 = vld [vmem:[%s1958_s7 + $0x50] sm:$0xff]  ;;  %v714_v41 = vld [vmem:[%s1958_s7 + $0x48] sm:$0xff] }
  0x45   : > { %1129 = vmatprep.subr.mxu1 %v1494_v1  ;;  %s1988_s3 = sld [smem:[#allocation21_spill]]  ;;  %1173 = vmatprep.subr.mxu0 %v1494_v1  ;;  %v713_v42 = vld [vmem:[%s1958_s7 + $0x40] sm:$0xff]  ;;  %v712_v43 = vld [vmem:[%s1958_s7 + $0x38] sm:$0xff]  ;;  %v711_v44 = vld [vmem:[%s1958_s7 + $0x30] sm:$0xff]  ;;  %s1815_s19 = sshll.u32 %s1812_s18, 3 }
  0x46   : > { %1130 = vmatpush3.msra.mxu1 %v489_v3  ;;  %s1989_s5 = sld [smem:[#allocation23_spill]]  ;;  %1174 = vmatpush3.msra.mxu0 %v719_v36  ;;  %v710_v45 = vld [vmem:[%s1958_s7 + $0x28] sm:$0xff]  ;;  %v709_v46 = vld [vmem:[%s1958_s7 + $0x20] sm:$0xff]  ;;  %v708_v47 = vld [vmem:[%s1958_s7 + $0x18] sm:$0xff]  ;;  %s1966_s29 = scalar_lea.vmem [#allocation10], %s1815_s19 }
  0x47   : > { %1131 = vmatprep.subr.mxu1 %v1494_v1  ;;  %s478_s20 = scalar_lea.vmem %s1985_s0, %s1068_s26  ;;  %1175 = vmatprep.subr.mxu0 %v1494_v1  ;;  %v707_v48 = vld [vmem:[%s1958_s7 + $0x10] sm:$0xff]  ;;  %v706_v49 = vld [vmem:[%s1958_s7 + $0x8] sm:$0xff]  ;;  %v705_v50 = vld [vmem:[%s1958_s7] sm:$0xff]  ;;  %s697_s15 = sld [smem:[#allocation6]] }
  0x48   : > { %1132 = vmatpush3.msra.mxu1 %v488_v4  ;;  %v483_v9 = vld [vmem:[%s478_s20] sm:$0xff]  ;;  %1176 = vmatpush3.msra.mxu0 %v718_v37  ;;  %s1967_s20 = scalar_lea.vmem [#allocation11], %s1815_s19  ;;  %s453_s28 = scalar_lea.vmem [#allocation7], %s1815_s19 }
  0x49   : > { %1133 = vmatprep.subr.mxu1 %v1494_v1  ;;  %v600_v10 = vld [vmem:[%s1986_s4 + $0x58] sm:$0xff]  ;;  %v599_v11 = vld [vmem:[%s1986_s4 + $0x50] sm:$0xff]  ;;  %v598_v12 = vld [vmem:[%s1986_s4 + $0x48] sm:$0xff]  ;;  %1177 = vmatprep.subr.mxu0 %v1494_v1  ;;  %s1827_s16 = sshll.u32 %s1586_s25, 7 }
  0x4a   : > { %1134 = vmatpush3.msra.mxu1 %v487_v5  ;;  %v597_v13 = vld [vmem:[%s1986_s4 + $0x40] sm:$0xff]  ;;  %v596_v14 = vld [vmem:[%s1986_s4 + $0x38] sm:$0xff]  ;;  %v595_v15 = vld [vmem:[%s1986_s4 + $0x30] sm:$0xff]  ;;  %s482_s17 = scalar_lea.vmem %s1987_s1, %s1068_s26  ;;  %1178 = vmatpush3.msra.mxu0 %v717_v38  ;;  %s827_s0 = scalar_lea.hbm %s1960_s9, %s1827_s16 }
  0x4b   : > { %1135 = vmatprep.subr.mxu1 %v1494_v1  ;;  %v594_v16 = vld [vmem:[%s1986_s4 + $0x28] sm:$0xff]  ;;  %v593_v17 = vld [vmem:[%s1986_s4 + $0x20] sm:$0xff]  ;;  %v592_v18 = vld [vmem:[%s1986_s4 + $0x18] sm:$0xff]  ;;  %1179 = vmatprep.subr.mxu0 %v1494_v1 }
  0x4c   : > { %1136 = vmatpush3.msra.mxu1 %v486_v6  ;;  %v591_v19 = vld [vmem:[%s1986_s4 + $0x10] sm:$0xff]  ;;  %v590_v20 = vld [vmem:[%s1986_s4 + $0x8] sm:$0xff]  ;;  %v589_v21 = vld [vmem:[%s1986_s4] sm:$0xff]  ;;  %1180 = vmatpush3.msra.mxu0 %v716_v39 }
  0x4d   : > { %1137 = vmatprep.subr.mxu1 %v1494_v1  ;;  %v588_v22 = vld [vmem:[%s482_s17] sm:$0xff]  ;;  %1181 = vmatprep.subr.mxu0 %v1494_v1  ;;  %s1074_s17 = sld [smem:[#allocation6 + $0x1]]  ;;  %v698_v4 = vstv %s697_s15  ;;  %s829_s15 = sshll.u32 %s453_s28, 4  ;;  %s830_s15 = int_to_ptr.vmem [resolvable:$true] %s829_s15 }
  0x4e   : > { %1138 = vmatpush3.msra.mxu1 %v485_v7  ;;  %v1070_v23 = vld [vmem:[%s1988_s3] ss:$0 sm:$0xff]  ;;  %1182 = vmatpush3.msra.mxu0 %v715_v40 }
  0x4f   : > { %1139 = vmatprep.subr.mxu1 %v1494_v1  ;;  %v1072_v29 = vld [vmem:[%s1989_s5] ss:$0 sm:$0xff]  ;;  %1183 = vmatprep.subr.mxu0 %v1494_v1 }
  0x50   : > { %1140 = vmatpush3.msra.mxu1 %v484_v8  ;;  %1184 = vmatpush3.msra.mxu0 %v714_v41 }
  0x51   : > { %1142 = vmatmul.mubr.msk.f32.vlgmr.msra.gmra.mxu1 %vm499_vm1, %v483_v9  ;;  %1144 = vmatprep.subr.mxu1 %v1494_v1 }
  0x52   : > { %1145 = vmatpush3.msra.mxu1 %v600_v10  ;;  %1168 = vmatprep.mubr.msk.f32.mxu1 %vm1495_vm0, %v1494_v1 }
  0x53   : > { %1146 = vmatprep.subr.mxu1 %v1494_v1  ;;  %1185 = vmatprep.subr.mxu0 %v1494_v1  ;;  %v701_v5 = vstv %s1074_s17  ;;  %s801_s17 = scalar_lea.sflag [#allocation4], %s1812_s18 }
  0x54   : > { %1147 = vmatpush3.msra.mxu1 %v599_v11  ;;  %1186 = vmatpush3.msra.mxu0 %v713_v42 }
  0x55   : > { %1148 = vmatprep.subr.mxu1 %v1494_v1  ;;  %1187 = vmatprep.subr.mxu0 %v1494_v1 }
  0x56   : > { %1149 = vmatpush3.msra.mxu1 %v598_v12  ;;  %1188 = vmatpush3.msra.mxu0 %v712_v43 }
  0x57   : > { %1150 = vmatprep.subr.mxu1 %v1494_v1  ;;  %1189 = vmatprep.subr.mxu0 %v1494_v1 }
  0x58   : > { %1151 = vmatpush3.msra.mxu1 %v597_v13  ;;  %1190 = vmatpush3.msra.mxu0 %v711_v44 }
  0x59   : > { %1152 = vmatprep.subr.mxu1 %v1494_v1  ;;  %1191 = vmatprep.subr.mxu0 %v1494_v1 }
  0x5a   : > { %1153 = vmatpush3.msra.mxu1 %v596_v14  ;;  %1192 = vmatpush3.msra.mxu0 %v710_v45 }
  0x5b   : > { %1154 = vmatprep.subr.mxu1 %v1494_v1  ;;  %1193 = vmatprep.subr.mxu0 %v1494_v1 }
  0x5c   : > { %1155 = vmatpush3.msra.mxu1 %v595_v15  ;;  %1194 = vmatpush3.msra.mxu0 %v709_v46 }
  0x5d   : > { %1156 = vmatprep.subr.mxu1 %v1494_v1  ;;  %1195 = vmatprep.subr.mxu0 %v1494_v1 }
  0x5e   : > { %1157 = vmatpush3.msra.mxu1 %v594_v16  ;;  %1196 = vmatpush3.msra.mxu0 %v708_v47 }
  0x5f   : > { %1158 = vmatprep.subr.mxu1 %v1494_v1  ;;  %1197 = vmatprep.subr.mxu0 %v1494_v1 }
  0x60   : > { %1159 = vmatpush3.msra.mxu1 %v593_v17  ;;  %1198 = vmatpush3.msra.mxu0 %v707_v48 }
  0x61   : > { %1160 = vmatprep.subr.mxu1 %v1494_v1  ;;  %1199 = vmatprep.subr.mxu0 %v1494_v1 }
  0x62   : > { %1161 = vmatpush3.msra.mxu1 %v592_v18  ;;  %1200 = vmatpush3.msra.mxu0 %v706_v49 }
  0x63   : > { %1162 = vmatprep.subr.mxu1 %v1494_v1  ;;  %1201 = vmatprep.subr.mxu0 %v1494_v1 }
  0x64   : > { %1163 = vmatpush3.msra.mxu1 %v591_v19  ;;  %1202 = vmatpush3.msra.mxu0 %v705_v50 }
  0x65   : > { %1164 = vmatprep.subr.mxu1 %v1494_v1 }
  0x66   : > { %1165 = vmatpush3.msra.mxu1 %v590_v20 }
  0x67   : > { %1166 = vmatprep.subr.mxu1 %v1494_v1 }
  0x68   : > { %1167 = vmatpush3.msra.mxu1 %v589_v21 }
  0x69   : > { %1169 = vmatmul.mubr.msk.f32.vlgmr.msra.gmra.mxu1 %vm608_vm2, %v588_v22 }
 0x111   : > { %v569_v24 = vpop.f32.mrf.mxu1 }
 0x112   : > { %v570_v25 = vadd.f32 %v1070_v23, %v569_v24 }
 0x113   : > { %v1143_v26 = vpop.f32.mrf.mxu1 }
 0x114   : > { %v1737_v27 = vmax.f32 %v570_v25, 0.0 }
 0x116   : > { %v574_v28 = vmul.f32 %v1737_v27, %v1737_v27 }
 0x118   : > { %575 = vadd.xlane.f32.xlu0 %v574_v28 }
 0x129   : > { %v678_v30 = vpop.f32.mrf.mxu1 }
 0x12a   : > { %v679_v31 = vadd.f32 %v1072_v29, %v678_v30 }
 0x12b   : > { %v1170_v32 = vpop.f32.mrf.mxu1 }
 0x12c   : > { %v1744_v33 = vmax.f32 %v679_v31, 0.0 }
 0x12e   : > { %v683_v34 = vmul.f32 %v1744_v33, %v1744_v33 }
 0x130   : > { %684 = vadd.xlane.f32.xlu0 %v683_v34 }
 0x1a1   : > { %v576_v51 = vpop.xlane.xlu0 %575 }
 0x1a2   : > { %1285 = vrsqrt.f32 %v576_v51  ;;  %vm579_vm3 = vcmp.eq.f32.partialorder %v576_v51, inf  ;;  %v582_v54 = vand.u32 2147483648, %v576_v51  ;;  %vm581_vm4 = vcmp.eq.f32.partialorder %v576_v51, 0.0 }
 0x1af   : > { %v1286_v52 = vpop.eup %1285 }
 0x1b0   : > { %v578_v53 = vmul.f32 %v1286_v52, %v576_v51 }
 0x1b2   : > { %v580_v55 = vsel %vm579_vm3, %v576_v51, %v578_v53 }
 0x1b3   : > { %v583_v56 = vsel %vm581_vm4, %v582_v54, %v580_v55 }
 0x1b4   : > { %v584_v57 = vmax.f32 %v583_v56, 1e-12 }
 0x1b6   : > { %1287 = vrcp.f32 %v584_v57 }
 0x1b9   : > { %v685_v58 = vpop.xlane.xlu0 %684 }
 0x1ba   : > { %1289 = vrsqrt.f32 %v685_v58  ;;  %vm688_vm5 = vcmp.eq.f32.partialorder %v685_v58, inf  ;;  %v691_v63 = vand.u32 2147483648, %v685_v58  ;;  %vm690_vm6 = vcmp.eq.f32.partialorder %v685_v58, 0.0 }
 0x1c3   : > { %v1288_v59 = vpop.eup %1287 }
 0x1c4   : > { %v586_v60 = vmul.f32 %v1288_v59, %v1737_v27 }
 0x1c6   : > { %587 = vst [vmem:[%s1966_s29] sm:$0xff] %v586_v60  ;;  %v699_v7 = vmul.f32 %v698_v4, %v586_v60  ;;  %s1334_s29 = scalar_lea.vmem %s830_s15, 128 }
 0x1c7   : > { %v1290_v61 = vpop.eup %1289  ;;  %p1335_p10 = scmp.ne.s32.totalorder %s830_s15, %s1334_s29 }
 0x1c8   : > { %v687_v62 = vmul.f32 %v1290_v61, %v685_v58 }
 0x1c9   : > { %p1336_p12 = pnand %p1335_p10, %p1605_p5 }
 0x1ca   : > { %v689_v0 = vsel %vm688_vm5, %v685_v58, %v687_v62 }
 0x1cb   : > { %v692_v1 = vsel %vm690_vm6, %v691_v63, %v689_v0  ;;  %p1337_p8 = pneg %p1336_p12 }
 0x1cc   : > { %v693_v2 = vmax.f32 %v692_v1, 1e-12 }
 0x1ce   : > { %1291 = vrcp.f32 %v693_v2 }
 0x1db   : > { %v1292_v3 = vpop.eup %1291 }
 0x1dc   : > { %v695_v6 = vmul.f32 %v1292_v3, %v1744_v33 }
 0x1de   : > { %v702_v8 = vmul.f32 %v701_v5, %v695_v6  ;;  %696 = vst [vmem:[%s1967_s20] sm:$0xff] %v695_v6  ;;  %s1496_s20 = smov [#allocation7]  }
 0x1df   : > { %s1338_s1 = sshll.u32 %s1496_s20, 4  ;;  %s1339_s1 = int_to_ptr.vmem [resolvable:$false] %s1338_s1 }
 0x1e0   : > { %v703_v9 = vadd.f32 %v702_v8, %v699_v7  ;;  %s1340_s2 = scalar_lea.vmem %s1339_s1, 256  ;;  %p1341_p11 = scmp.lt.s32.totalorder %s830_s15, %s1339_s1 }
 0x1e1   : > { %p1342_p0 = scmp.lt.s32.totalorder %s1340_s2, %s1334_s29 }
 0x1e2   : > { %1204 = vmatmul.mubr.f32.vlgmr.msra.gmra.mxu0 %v703_v9  ;;  %704 = vst [vmem:[%s453_s28] sm:$0xff] %v703_v9 }
 0x1e3   : > { %p1343_p1 = por %p1342_p0, %p1341_p11 }
 0x1e5   : > { %p1344_p3 = pnand %p1343_p1, %p1337_p8 }
 0x1e7   : > { %1347 = shalt.err (!%p1344_p3)
}
 0x1e8   : > { %s1348_s3 = scalar_lea.hbm %s827_s0, 128  ;;  %s1352_s26 = scalar_lea.hbm %s1960_s9, 256 }
 0x1e9   : > { %p1349_p2 = scmp.ne.s32.totalorder %s827_s0, %s1348_s3  ;;  %p1353_p13 = scmp.lt.s32.totalorder %s827_s0, %s1960_s9 }
 0x1ea   : > { %p1354_p6 = scmp.lt.s32.totalorder %s1352_s26, %s1348_s3 }
 0x1eb   : > { %p1350_p4 = pnand %p1349_p2, %p1605_p5 }
 0x1ec   : > { %p1355_p9 = por %p1354_p6, %p1353_p13 }
 0x1ed   : > { %p1351_p7 = pneg %p1350_p4 }
 0x1ef   : > { %p1356_p10 = pnand %p1355_p9, %p1351_p7 }
 0x1f1   : > { %1359 = shalt.err (!%p1356_p10)
}
 0x1f2   : > { %1214 = dma.vmem_to_hbm [thread:$0]  (%p1605_p5), %s830_s15, 128, %s827_s0, %s801_s17  }
 0x1f3   : > { %s866_s29 = scalar_lea.hbm %s1963_s12, %s1827_s16  ;;  %s1990_s20 = scalar_lea.vmem [#allocation11], %s1815_s19 }
 0x1f4   : > { %s868_s28 = sshll.u32 %s1990_s20, 4  ;;  %s816_s4 = scalar_lea.sflag [#allocation12], %s1812_s18  ;;  %s869_s28 = int_to_ptr.vmem [resolvable:$true] %s868_s28 }
 0x1f5   : > { %s1360_s5 = scalar_lea.vmem %s869_s28, 128  ;;  %s1497_s3 = smov [#allocation11]  }
 0x1f6   : > { %p1361_p12 = scmp.ne.s32.totalorder %s869_s28, %s1360_s5  ;;  %s1364_s6 = sshll.u32 %s1497_s3, 4  ;;  %s1365_s6 = int_to_ptr.vmem [resolvable:$false] %s1364_s6 }
 0x1f7   : > { %s1366_s26 = scalar_lea.vmem %s1365_s6, 256  ;;  %p1367_p0 = scmp.lt.s32.totalorder %s869_s28, %s1365_s6 }
 0x1f8   : > { %p1362_p8 = pnand %p1361_p12, %p1605_p5  ;;  %p1368_p1 = scmp.lt.s32.totalorder %s1366_s26, %s1360_s5 }
 0x1fa   : > { %p1363_p11 = pneg %p1362_p8  ;;  %p1369_p3 = por %p1368_p1, %p1367_p0 }
 0x1fc   : > { %p1370_p2 = pnand %p1369_p3, %p1363_p11 }
 0x1fe   : > { %1373 = shalt.err (!%p1370_p2)
}
 0x1ff   : > { %s1374_s0 = scalar_lea.hbm %s866_s29, 128  ;;  %s1378_s17 = scalar_lea.hbm %s1963_s12, 256 }
 0x200   : > { %p1375_p4 = scmp.ne.s32.totalorder %s866_s29, %s1374_s0  ;;  %p1379_p6 = scmp.lt.s32.totalorder %s866_s29, %s1963_s12 }
 0x201   : > { %p1380_p9 = scmp.lt.s32.totalorder %s1378_s17, %s1374_s0 }
 0x202   : > { %p1376_p7 = pnand %p1375_p4, %p1605_p5 }
 0x203   : > { %p1381_p10 = por %p1380_p9, %p1379_p6 }
 0x204   : > { %p1377_p13 = pneg %p1376_p7 }
 0x206   : > { %p1382_p12 = pnand %p1381_p10, %p1377_p13 }
 0x208   : > { %1385 = shalt.err (!%p1382_p12)
}
 0x209   : > { %1217 = dma.vmem_to_hbm [thread:$0]  (%p1605_p5), %s869_s28, 128, %s866_s29, %s816_s4   ;;  %v1075_v10 = vld [vmem:[%s1959_s8] ss:$0 sm:$0xff]  ;;  %vm798_vm7 = vcmask 80896  }
 0x20a   : > { %s805_s20 = sand.u32 1, %s1586_s25   ;;  %s460_s6 = scalar_lea.vmem [#allocation8], %s1815_s19 }
 0x20b   : > { %s842_s26 = sshll.u32 %s460_s6, 4  ;;  %s1991_s0 = scalar_lea.vmem [#allocation10], %s1815_s19  ;;  %s1878_s26 = int_to_ptr.vmem [resolvable:$true] %s842_s26 }
 0x20c   : > { %s855_s18 = sshll.u32 %s1991_s0, 4  ;;  %s1876_s1 = scalar_lea.hbm %s1961_s10, %s1827_s16  ;;  %s1886_s18 = int_to_ptr.vmem [resolvable:$true] %s855_s18 }
 0x20d   : > { %s1884_s28 = scalar_lea.hbm %s1962_s11, %s1827_s16  ;;  %s1888_s19 = scalar_lea.sflag [#allocation9], %s805_s20 }
 0x20e   : > { %s1386_s4 = scalar_lea.vmem %s1878_s26, 128  ;;  %s1498_s2 = smov [#allocation8]  }
 0x20f   : > { %p1387_p8 = scmp.ne.s32.totalorder %s1878_s26, %s1386_s4  ;;  %s1390_s5 = sshll.u32 %s1498_s2, 4  ;;  %s1391_s5 = int_to_ptr.vmem [resolvable:$false] %s1390_s5 }
 0x210   : > { %s1392_s3 = scalar_lea.vmem %s1391_s5, 256  ;;  %p1393_p1 = scmp.lt.s32.totalorder %s1878_s26, %s1391_s5 }
 0x211   : > { %p1388_p11 = pnand %p1387_p8, %p1605_p5  ;;  %p1394_p3 = scmp.lt.s32.totalorder %s1392_s3, %s1386_s4 }
 0x213   : > { %p1389_p0 = pneg %p1388_p11  ;;  %p1395_p2 = por %p1394_p3, %p1393_p1 }
 0x215   : > { %p1396_p4 = pnand %p1395_p2, %p1389_p0 }
 0x2a2   : > { %v794_v11 = vpop.f32.mrf.mxu0 }
 0x2a3   : > { %v795_v12 = vadd.f32 %v1075_v10, %v794_v11 }
 0x2a4   : > { %v1205_v13 = vpop.f32.mrf.mxu0 }
 0x2a5   : > { %799 = vst.msk [vmem:[%s460_s6] sm:$0xff] %vm798_vm7, %v795_v12 }
 0x2a6   : > { %1399 = shalt.err (!%p1396_p4)
}
 0x2a7   : > { %s1400_s16 = scalar_lea.hbm %s1876_s1, 128  ;;  %s1404_s0 = scalar_lea.hbm %s1961_s10, 256 }
 0x2a8   : > { %p1401_p7 = scmp.ne.s32.totalorder %s1876_s1, %s1400_s16  ;;  %p1405_p9 = scmp.lt.s32.totalorder %s1876_s1, %s1961_s10 }
 0x2a9   : > { %p1406_p10 = scmp.lt.s32.totalorder %s1404_s0, %s1400_s16 }
 0x2aa   : > { %p1402_p13 = pnand %p1401_p7, %p1605_p5 }
 0x2ab   : > { %p1407_p12 = por %p1406_p10, %p1405_p9 }
 0x2ac   : > { %p1403_p6 = pneg %p1402_p13 }
 0x2ae   : > { %p1408_p8 = pnand %p1407_p12, %p1403_p6 }
 0x2b0   : > { %1411 = shalt.err (!%p1408_p8)
}
 0x2b1   : > { %1215 = dma.vmem_to_hbm [thread:$0]  (%p1605_p5), %s1878_s26, 128, %s1876_s1, %s1888_s19  }
 0x2b2   : > { %s1412_s25 = scalar_lea.vmem %s1886_s18, 128  ;;  %s1499_s29 = smov [#allocation10]  }
 0x2b3   : > { %p1413_p11 = scmp.ne.s32.totalorder %s1886_s18, %s1412_s25  ;;  %s1416_s4 = sshll.u32 %s1499_s29, 4  ;;  %s1417_s4 = int_to_ptr.vmem [resolvable:$false] %s1416_s4 }
 0x2b4   : > { %s1418_s2 = scalar_lea.vmem %s1417_s4, 256  ;;  %p1419_p3 = scmp.lt.s32.totalorder %s1886_s18, %s1417_s4 }
 0x2b5   : > { %p1414_p0 = pnand %p1413_p11, %p1605_p5  ;;  %p1420_p2 = scmp.lt.s32.totalorder %s1418_s2, %s1412_s25 }
 0x2b7   : > { %p1415_p1 = pneg %p1414_p0  ;;  %p1421_p4 = por %p1420_p2, %p1419_p3 }
 0x2b9   : > { %p1422_p7 = pnand %p1421_p4, %p1415_p1 }
 0x2bb   : > { %1425 = shalt.err (!%p1422_p7)
}
 0x2bc   : > { %s1426_s5 = scalar_lea.hbm %s1884_s28, 128  ;;  %s1430_s3 = scalar_lea.hbm %s1962_s11, 256 }
 0x2bd   : > { %p1427_p13 = scmp.ne.s32.totalorder %s1884_s28, %s1426_s5  ;;  %p1431_p10 = scmp.lt.s32.totalorder %s1884_s28, %s1962_s11 }
 0x2be   : > { %p1432_p12 = scmp.lt.s32.totalorder %s1430_s3, %s1426_s5 }
 0x2bf   : > { %p1428_p6 = pnand %p1427_p13, %p1605_p5 }
 0x2c0   : > { %p1433_p8 = por %p1432_p12, %p1431_p10 }
 0x2c1   : > { %p1429_p9 = pneg %p1428_p6 }
 0x2c3   : > { %p1434_p11 = pnand %p1433_p8, %p1429_p9 }
 0x2c5   : > { %1437 = shalt.err (!%p1434_p11)
}
 0x2c6   : > { %1216 = dma.vmem_to_hbm [thread:$0]  (%p1605_p5), %s1886_s18, 128, %s1884_s28, %s1888_s19  }
 0x2c7 PF: > { %p1246_p0 = scmp.ge.s32.totalorder %s1488_s24, 2  ;;  %s880_s6 = sand.u32 1, %s1476_s21  }
 0x2c8   : > { %p1992_p1 = scmp.ne.s32.totalorder %s1976_s14, 0  ;;  %s881_s0 = scalar_lea.sflag [#allocation4], %s880_s6 }
 0x2ca   : > { %p1230_p3 = pnand %p1246_p0, %p1992_p1 }
 0x2cc   : > { %p1231_p2 = pneg %p1230_p3 }
 0x2ce   : > { %1463 = dma.done.wait (%p1231_p2), %s881_s0, 128  }
 0x2cf   : > { %1465 = vsyncadd (%p1231_p2), %s881_s0, 4294967168  ;;  %s1993_s15 = sadd.s32 4294967294, %s1488_s24  }
 0x2d0   : > { %s889_s17 = sand.u32 1, %s1993_s15  }
 0x2d1   : > { %s890_s13 = scalar_lea.sflag [#allocation9], %s889_s17 }
 0x2d2   : > { %1467 = dma.done.wait (%p1231_p2), %s890_s13, 256  }
 0x2d3   : > { %1469 = vsyncadd (%p1231_p2), %s890_s13, 4294967040  ;;  %s908_s25 = scalar_lea.sflag [#allocation12], %s880_s6 }
 0x2d4   : > { %1471 = dma.done.wait (%p1231_p2), %s908_s25, 128  }
 0x2d5   : > { %1473 = vsyncadd (%p1231_p2), %s908_s25, 4294967168  ;;  %p31_p5 = scmp.ge.s32.totalorder %s1590_s27, 4   ;;  %s1994_s21 = smov %s1480_s22 }
 0x2d6   : > { %s1995_s22 = smov %s1484_s23  ;;  %s1996_s23 = smov %s1603_s30 }
 0x2d7   : > { %s1997_s24 = smov %s1590_s27  ;;  %33 = sbr.rel (!%p31_p5) target bundleno = 17 (0x11), region = 153 }
 0x2dc   :  { %913 = vsyncpa [#allocation3], 1 }
 0x2dd   :  { %915 = vsyncpa [#allocation3 + $0x1], 1 }
 0x2de   :  { %916 = vsyncpa [#allocation4], 1 }
 0x2df   :  { %918 = vsyncpa [#allocation4 + $0x1], 1 }
 0x2e0   :  { %919 = vsyncpa [#allocation9], 1 }
 0x2e1   :  { %921 = vsyncpa [#allocation9 + $0x1], 1 }
 0x2e2   :  { %922 = vsyncpa [#allocation12], 1 }
 0x2e3   :  { %924 = vsyncpa [#allocation12 + $0x1], 1 }
 0x2e4   :  { %925 = vsyncpa [#allocation5], 1 }
 0x2e5   :  { %927 = vsyncpa [#allocation5 + $0x1], 1 }

</bundles_post_ra>
